<compile_context>
chip_gen: v7x
topology: tpu7x:2x2x1
jax: 0.10.0
libtpu: 0.0.40
codegen_flags: <defaults>
</compile_context>

<pallas_src>
import jax
import jax.numpy as jnp
from jax import lax
from jax.experimental import pallas as pl
from jax.experimental.pallas import tpu as pltpu


def _qct_kernel(pf_ref, e1_ref, e2_ref, out_ref):
    e1 = e1_ref[...].astype(jnp.float32)          # (TB, D)
    e2 = e2_ref[...].astype(jnp.float32)          # (TB, D)

    # Quantum state fidelity: normalize each embedding, |dot|^2.
    dot = jnp.sum(e1 * e2, axis=-1, keepdims=True)                    # (TB, 1)
    n1 = jnp.sqrt(jnp.sum(e1 * e1, axis=-1, keepdims=True)) + 1e-8    # (TB, 1)
    n2 = jnp.sqrt(jnp.sum(e2 * e2, axis=-1, keepdims=True)) + 1e-8    # (TB, 1)

    cosine = dot / (n1 * n2)                                          # exact divide
    fidelity = cosine * cosine                                        # |x|^2 == x^2

    # Parameter-dependent similarity surrogate; factor precomputed in wrapper,
    # read as a single f32 scalar from SMEM.
    param_factor = pf_ref[0]
    similarity = fidelity * param_factor                              # (TB, 1)

    # One fused store: column 0 = similarity, column 1 = fidelity.
    col = lax.broadcasted_iota(jnp.int32, out_ref.shape, 1)           # (TB, 2)
    combined = jnp.where(col == 0, similarity, fidelity)              # VPU select
    out_ref[...] = combined.astype(out_ref.dtype)


def quantum_circuit_trainer_forward(embedding1, embedding2, quantum_params,
                                    *, block_b=8192):
    """Returns (similarities, fidelities), each shape (B,) float32."""
    B, D = embedding1.shape

    # Batch-independent quantum-parameter factor (tiny; one XLA op outside the
    # streaming kernel).  Shaped (1,) for SMEM placement.
    param_factor = jnp.mean(
        jnp.cos(quantum_params.astype(jnp.float32)) ** 2).reshape(1)

    # Batch tile: whole batch if small (single grid step), otherwise large
    # row tiles (multiple of 8/128) to amortize per-step overhead.
    tb = B if B <= block_b else block_b
    grid = (pl.cdiv(B, tb),)

    # Real VMEM footprint with lane padding to 128:
    #   inputs : 2 arrays x tb*512 B x 2 (double buffer) = tb*2048 B
    #   output : tb*512 B x 2 (double buffer)            = tb*1024 B
    vmem_limit = int(max(16 << 20, tb * 3072 + (4 << 20)))

    out = pl.pallas_call(
        _qct_kernel,
        out_shape=jax.ShapeDtypeStruct((B, 2), jnp.float32),
        grid_spec=pltpu.PrefetchScalarGridSpec(
            num_scalar_prefetch=0,
            grid=grid,
            in_specs=[
                # scalar param factor -> SMEM (no lane-padded VMEM buffer pair)
                pl.BlockSpec(memory_space=pltpu.MemorySpace.SMEM),
                pl.BlockSpec((tb, D), lambda i: (i, 0)),   # embedding1
                pl.BlockSpec((tb, D), lambda i: (i, 0)),   # embedding2
            ],
            out_specs=pl.BlockSpec((tb, 2), lambda i: (i, 0)),
        ),
        compiler_params=pltpu.CompilerParams(
            dimension_semantics=("parallel",),
            vmem_limit_bytes=vmem_limit,
        ),
    )(param_factor, embedding1, embedding2)

    return out[:, 0], out[:, 1]


if __name__ == "__main__":
    # Module config (synthetic, deterministic): n_qubits=4, circuit_depth=3.
    n_qubits = 4
    circuit_depth = 3

    key = jax.random.PRNGKey(0)
    k_p, k_e1, k_e2 = jax.random.split(key, 3)

    # quantum_params = randn(circuit_depth * n_qubits) * 0.1  (deterministic init)
    quantum_params = jax.random.normal(k_p, (circuit_depth * n_qubits,),
                                       dtype=jnp.float32) * 0.1

    # Small embedding inputs: batch=8, dim=64.
    B, D = 8, 64
    embedding1 = jax.random.normal(k_e1, (B, D), dtype=jnp.float32)
    embedding2 = jax.random.normal(k_e2, (B, D), dtype=jnp.float32)

    sims, fids = quantum_circuit_trainer_forward(embedding1, embedding2,
                                                 quantum_params)
    jax.block_until_ready((sims, fids))

    # Reference check for the fidelity path (exact semantics from the module).
    e1n = embedding1 / (jnp.linalg.norm(embedding1, axis=-1, keepdims=True) + 1e-8)
    e2n = embedding2 / (jnp.linalg.norm(embedding2, axis=-1, keepdims=True) + 1e-8)
    fid_ref = jnp.abs(jnp.sum(e1n * e2n, axis=-1)) ** 2
    assert jnp.allclose(fids, fid_ref, atol=1e-5), "fidelity mismatch"

    # Reference check for the (surrogate) similarity path.
    pf_ref = jnp.mean(jnp.cos(quantum_params) ** 2)
    sim_ref = fid_ref * pf_ref
    assert jnp.allclose(sims, sim_ref, atol=1e-5), "similarity mismatch"

    assert sims.shape == (B,) and fids.shape == (B,)
    assert sims.dtype == jnp.float32 and fids.dtype == jnp.float32

    print("KERNEL_OK")
</pallas_src>

<mosaic_0001>
module attributes {stable_mosaic.version = 11 : i64} {
  func.func @_qct_kernel(%arg0: i32, %arg1: memref<1xf32, #tpu.memory_space<smem>>, %arg2: memref<8x64xf32, #tpu.memory_space<vmem>>, %arg3: memref<8x64xf32, #tpu.memory_space<vmem>>, %arg4: memref<8x2xf32, #tpu.memory_space<vmem>>) attributes {dimension_semantics = [#tpu.dimension_semantics<parallel>], iteration_bounds = array<i64: 1>, scalar_prefetch = 0 : i64, scratch_operands = 0 : i64, tpu.core_type = #tpu.core_type<tc>, window_params = [{transform_indices = @transform_0, window_bounds = array<i64: 1>}, {transform_indices = @transform_1, window_bounds = array<i64: 8, 64>}, {transform_indices = @transform_2, window_bounds = array<i64: 8, 64>}, {transform_indices = @transform_3, window_bounds = array<i64: 8, 2>}]} {
    %c0 = arith.constant 0 : index
    %c0_0 = arith.constant 0 : index
    %0 = vector.load %arg2[%c0, %c0_0] : memref<8x64xf32, #tpu.memory_space<vmem>>, vector<8x64xf32>
    %c0_1 = arith.constant 0 : index
    %c0_2 = arith.constant 0 : index
    %1 = vector.load %arg3[%c0_1, %c0_2] : memref<8x64xf32, #tpu.memory_space<vmem>>, vector<8x64xf32>
    %2 = arith.mulf %0, %1 : vector<8x64xf32>
    %cst = arith.constant dense<0.000000e+00> : vector<8xf32>
    %3 = vector.multi_reduction <add>, %2, %cst [1] : vector<8x64xf32> to vector<8xf32>
    %4 = vector.shape_cast %3 : vector<8xf32> to vector<8x1xf32>
    %5 = arith.mulf %0, %0 : vector<8x64xf32>
    %cst_3 = arith.constant dense<0.000000e+00> : vector<8xf32>
    %6 = vector.multi_reduction <add>, %5, %cst_3 [1] : vector<8x64xf32> to vector<8xf32>
    %7 = vector.shape_cast %6 : vector<8xf32> to vector<8x1xf32>
    %8 = math.sqrt %7 : vector<8x1xf32>
    %cst_4 = arith.constant 9.99999993E-9 : f32
    %9 = vector.broadcast %cst_4 : f32 to vector<8x1xf32>
    %10 = arith.addf %8, %9 : vector<8x1xf32>
    %11 = arith.mulf %1, %1 : vector<8x64xf32>
    %cst_5 = arith.constant dense<0.000000e+00> : vector<8xf32>
    %12 = vector.multi_reduction <add>, %11, %cst_5 [1] : vector<8x64xf32> to vector<8xf32>
    %13 = vector.shape_cast %12 : vector<8xf32> to vector<8x1xf32>
    %14 = math.sqrt %13 : vector<8x1xf32>
    %cst_6 = arith.constant 9.99999993E-9 : f32
    %15 = vector.broadcast %cst_6 : f32 to vector<8x1xf32>
    %16 = arith.addf %14, %15 : vector<8x1xf32>
    %17 = arith.mulf %10, %16 : vector<8x1xf32>
    %18 = arith.divf %4, %17 : vector<8x1xf32>
    %19 = arith.mulf %18, %18 : vector<8x1xf32>
    %c0_7 = arith.constant 0 : index
    %20 = memref.load %arg1[%c0_7] : memref<1xf32, #tpu.memory_space<smem>>
    %21 = vector.broadcast %20 : f32 to vector<8x1xf32>
    %22 = arith.mulf %19, %21 : vector<8x1xf32>
    %23 = tpu.iota {dimensions = array<i32: 1>} : vector<8x2xi32>
    %c0_i32 = arith.constant 0 : i32
    %24 = vector.broadcast %c0_i32 : i32 to vector<8x2xi32>
    %25 = arith.cmpi eq, %23, %24 : vector<8x2xi32>
    %26 = vector.shape_cast %22 : vector<8x1xf32> to vector<8x1xf32>
    %27 = vector.broadcast %26 : vector<8x1xf32> to vector<8x2xf32>
    %28 = vector.shape_cast %19 : vector<8x1xf32> to vector<8x1xf32>
    %29 = vector.broadcast %28 : vector<8x1xf32> to vector<8x2xf32>
    %30 = arith.select %25, %27, %29 : vector<8x2xi1>, vector<8x2xf32>
    %c0_8 = arith.constant 0 : index
    %c0_9 = arith.constant 0 : index
    %31 = vector.load %arg4[%c0_8, %c0_9] : memref<8x2xf32, #tpu.memory_space<vmem>>, vector<8x2xf32>
    tpu.vector_store %arg4[%c0_8, %c0_9], %30 {strides = array<i32>} : memref<8x2xf32, #tpu.memory_space<vmem>>, vector<8x2xf32>,
    return
  }
  func.func @transform_0(%arg0: i32) -> i32 {
    %c0_i32 = arith.constant 0 : i32
    %c0_i32_0 = arith.constant 0 : i32
    return %c0_i32 : i32
  }
  func.func @transform_1(%arg0: i32) -> (i32, i32) {
    %c0_i32 = arith.constant 0 : i32
    %c0_i32_0 = arith.constant 0 : i32
    return %arg0, %c0_i32 : i32, i32
  }
  func.func @transform_2(%arg0: i32) -> (i32, i32) {
    %c0_i32 = arith.constant 0 : i32
    %c0_i32_0 = arith.constant 0 : i32
    return %arg0, %c0_i32 : i32, i32
  }
  func.func @transform_3(%arg0: i32) -> (i32, i32) {
    %c0_i32 = arith.constant 0 : i32
    %c0_i32_0 = arith.constant 0 : i32
    return %arg0, %c0_i32 : i32, i32
  }
}

</mosaic_0001>

<bundles_post_ra>
// kernel: tpu_custom_call.1
= control target key start
LH: loop header
LB: loop body
LE: loop exit
PB: predicated region body
PF: predicated region fallthrough
CT: control target
= control target key end

     0   :  { %9 = vsyncpa [#allocation4], 0  ;;  %s197_s0 = inlined_call_operand.<no memory space> [shape: f32[1], index: 0, kind: input, shape index: {}]   ;;  %s198_s1 = inlined_call_operand.hbm [shape: f32[8,64], index: 1, kind: input, shape index: {}]   ;;  %s199_s2 = inlined_call_operand.hbm [shape: f32[8,64], index: 2, kind: input, shape index: {}]   ;;  %s200_s3 = inlined_call_operand.vmem [shape: f32[8,2], index: 3, kind: output, shape index: {}]  }
   0x1   :  { %10 = vsyncpa [#allocation6], 0  ;;  %s145_s12 = smov [#allocation3]   ;;  %s146_s14 = smov [#allocation5]  }
   0x2   :  { %s19_s13 = sshll.u32 %s145_s12, 4  ;;  %s29_s15 = sshll.u32 %s146_s14, 4  ;;  %s20_s13 = int_to_ptr.vmem [resolvable:$true] %s19_s13  ;;  %s30_s15 = int_to_ptr.vmem [resolvable:$true] %s29_s15 }
   0x3   :  { %s97_s18 = scalar_lea.hbm %s198_s1, 128 }
   0x4   :  { %p98_p0 = scmp.ne.s32.totalorder %s198_s1, %s97_s18  ;;  %p101_p1 = scmp.lt.u32.totalorder %s97_s18, %s198_s1 }
   0x6   :  { %p103_p2 = pnand %p101_p1, %p98_p0 }
   0x8   :  { %106 = shalt.err (!%p103_p2)
}
   0x9   :  { %s107_s23 = scalar_lea.vmem %s20_s13, 128  ;;  %p112_p4 = scmp.lt.s32.totalorder %s20_s13, %s20_s13 }
   0xa   :  { %p108_p3 = scmp.ne.s32.totalorder %s20_s13, %s107_s23  ;;  %p113_p5 = scmp.lt.s32.totalorder %s107_s23, %s107_s23 }
   0xc   :  { %p114_p6 = por %p113_p5, %p112_p4 }
   0xe   :  { %p115_p7 = pnand %p114_p6, %p108_p3 }
  0x10   :  { %118 = shalt.err (!%p115_p7)
}
  0x11   :  { %22 = dma.hbm_to_vmem [thread:$0]  %s198_s1, 128, %s20_s13, [#allocation4]  }
  0x12   :  { %s119_s28 = scalar_lea.hbm %s199_s2, 128 }
  0x13   :  { %p120_p8 = scmp.ne.s32.totalorder %s199_s2, %s119_s28  ;;  %p123_p9 = scmp.lt.u32.totalorder %s119_s28, %s199_s2 }
  0x15   :  { %p125_p10 = pnand %p123_p9, %p120_p8 }
  0x17   :  { %128 = shalt.err (!%p125_p10)
}
  0x18   :  { %s129_s6 = scalar_lea.vmem %s30_s15, 128  ;;  %p134_p12 = scmp.lt.s32.totalorder %s30_s15, %s30_s15 }
  0x19   :  { %p130_p11 = scmp.ne.s32.totalorder %s30_s15, %s129_s6  ;;  %p135_p13 = scmp.lt.s32.totalorder %s129_s6, %s129_s6 }
  0x1b   :  { %p136_p0 = por %p135_p13, %p134_p12 }
  0x1d   :  { %p137_p1 = pnand %p136_p0, %p130_p11 }
  0x1f   :  { %140 = shalt.err (!%p137_p1)
}
  0x20   :  { %32 = dma.hbm_to_vmem [thread:$0]  %s199_s2, 128, %s30_s15, [#allocation6]  }
  0x21   :  { %141 = dma.done.wait [#allocation4], 128  }
  0x22   :  { %142 = vsyncadd [#allocation4], 4294967168 }
  0x23   :  { %143 = dma.done.wait [#allocation6], 128  }
  0x24   :  { %144 = vsyncadd [#allocation6], 4294967168  ;;  %v39_v0 = vld [vmem:[#allocation3] sm:$0xff]  ;;  %vm42_vm0 = vcmask 523264   ;;  %v40_v1 = vld [vmem:[#allocation5] sm:$0xff]  ;;  %v77_v23 = vlaneseq  ;;  %v75_v28 = vstv %s197_s0  ;;  %vm81_vm6 = vcmask 15360  }
  0x25   :  { %v46_v2 = vmul.f32 %v39_v0, %v39_v0  ;;  %v58_v3 = vmul.f32 %v40_v1, %v40_v1  ;;  %v41_v4 = vmul.f32 %v40_v1, %v39_v0 }
  0x26   :  { %v78_v26 = vand.u32 127, %v77_v23 }
  0x27   :  { %v47_v5 = vsel %vm42_vm0, %v46_v2, 0.0  ;;  %v43_v6 = vsel %vm42_vm0, %v41_v4, 0.0  ;;  %v59_v7 = vsel %vm42_vm0, %v58_v3, 0.0 }
  0x28   :  { %48 = vadd.xlane.f32.xlu0 %v47_v5  ;;  %44 = vadd.xlane.f32.xlu1 %v43_v6  ;;  %vm79_vm5 = vcmp.eq.s32.totalorder %v78_v26, 0 }
  0x2c   :  { %60 = vadd.xlane.f32.xlu0 %v59_v7 }
  0xb5   :  { %v49_v8 = vpop.xlane.xlu0 %48  ;;  %v45_v24 = vpop.xlane.xlu1 %44 }
  0xb6   :  { %91 = vrsqrt.f32 %v49_v8  ;;  %vm52_vm1 = vcmp.eq.f32.partialorder %v49_v8, inf  ;;  %v55_v14 = vand.u32 2147483648, %v49_v8  ;;  %vm54_vm2 = vcmp.eq.f32.partialorder %v49_v8, 0.0 }
  0xb9   :  { %v61_v9 = vpop.xlane.xlu0 %60 }
  0xba   :  { %93 = vrsqrt.f32 %v61_v9  ;;  %vm64_vm3 = vcmp.eq.f32.partialorder %v61_v9, inf  ;;  %v67_v17 = vand.u32 2147483648, %v61_v9  ;;  %vm66_vm4 = vcmp.eq.f32.partialorder %v61_v9, 0.0 }
  0xc0   :  { %v92_v10 = vpop.eup %91 }
  0xc1   :  { %v51_v11 = vmul.f32 %v92_v10, %v49_v8 }
  0xc3   :  { %v53_v12 = vsel %vm52_vm1, %v49_v8, %v51_v11 }
  0xc4   :  { %v94_v13 = vpop.eup %93  ;;  %v56_v16 = vsel %vm54_vm2, %v55_v14, %v53_v12 }
  0xc5   :  { %v63_v15 = vmul.f32 %v94_v13, %v61_v9  ;;  %v57_v21 = vadd.f32 1e-08, %v56_v16 }
  0xc7   :  { %v65_v18 = vsel %vm64_vm3, %v61_v9, %v63_v15 }
  0xc8   :  { %v68_v19 = vsel %vm66_vm4, %v67_v17, %v65_v18 }
  0xc9   :  { %v69_v20 = vadd.f32 1e-08, %v68_v19 }
  0xcb   :  { %v70_v22 = vmul.f32 %v69_v20, %v57_v21 }
  0xcd   :  { %95 = vrcp.f32 %v70_v22 }
  0xd7   :  { %v96_v25 = vpop.eup %95 }
  0xd8   :  { %v72_v27 = vmul.f32 %v96_v25, %v45_v24 }
  0xda   :  { %v73_v29 = vmul.f32 %v72_v27, %v72_v27 }
  0xdc   :  { %v76_v30 = vmul.f32 %v75_v28, %v73_v29 }
  0xde   :  { %v80_v31 = vsel %vm79_vm5, %v76_v30, %v73_v29 }
  0xdf   :  { %82 = vst.msk [vmem:[%s200_s3] sm:$0xff] %vm81_vm6, %v80_v31 }
  0xe0   :  { %87 = vsyncpa [#allocation4], 1 }
  0xe1   :  { %88 = vsyncpa [#allocation6], 1 }

</bundles_post_ra>
